<compile_context>
chip_gen: v7x
topology: tpu7x:2x2x1
jax: 0.10.0
libtpu: 0.0.40
codegen_flags: <defaults>
</compile_context>

<pallas_src>
import jax
import jax.numpy as jnp
import numpy as np
from jax import lax
from jax.experimental import pallas as pl
from jax.experimental.pallas import tpu as pltpu


def _mlp_kernel(x_ref, w1_ref, b1_ref, w2_ref, b2_ref,
                w3_ref, b3_ref, w4_ref, b4_ref, o_ref):
    # x_ref: (tile_b, in_size) in the natural [batch, features] layout.
    x = x_ref[...]
    # Layer 1: (16, in) . (tile_b, in)^T -> (16, tile_b); rhs-transposed MXU
    # dot puts the batch dimension on the 128-lane axis from here on.
    h = lax.dot_general(w1_ref[...], x,
                        dimension_numbers=(((1,), (1,)), ((), ())),
                        preferred_element_type=jnp.float32)
    h = jnp.maximum(h + b1_ref[...], 0.0)
    # Layer 2: (8, 16) @ (16, tile_b)
    h = jnp.dot(w2_ref[...], h, preferred_element_type=jnp.float32)
    h = jnp.maximum(h + b2_ref[...], 0.0)
    # Layer 3: (4, 8) @ (8, tile_b)
    h = jnp.dot(w3_ref[...], h, preferred_element_type=jnp.float32)
    h = jnp.maximum(h + b3_ref[...], 0.0)
    # Output layer (1 row): VPU broadcast-multiply + 4-row sublane reduce,
    # cheaper than pushing a 1-wide result through the MXU.
    y = jnp.sum(h * w4_ref[...], axis=0, keepdims=True) + b4_ref[...]
    o_ref[...] = y.astype(o_ref.dtype)   # lane-dense (1, tile_b) store


def _round_up(x, m):
    return ((x + m - 1) // m) * m


def regression_model_forward(x, params, *, max_tile_bytes=4 * 1024 * 1024):
    """x: [B, input_size] -> [B, 1] float32."""
    (w1, b1), (w2, b2), (w3, b3), (w4, b4) = params
    B, in_size = x.shape

    # Output-layer weight as a [4, 1] column for the VPU multiply+reduce path.
    w4_col = w4.reshape(-1, 1)

    # VMEM cost of one x block = tile_b * round_up(in_size, 128) * 4 bytes
    # (feature axis sits on lanes and pads to 128); the pipeline double-buffers
    # it.  ~4 MiB per buffer is safe on v7x/v6e/v5e and saturates HBM.
    lane_padded_row_bytes = _round_up(in_size, 128) * 4
    tile_cap = max(128, (max_tile_bytes // lane_padded_row_bytes) // 128 * 128)
    # Prefer >= 2 grid steps so v7x can shard the batch axis across both
    # TensorCores (harmless single step only when B itself is tiny).
    tile_want = max(128, _round_up((B + 1) // 2, 128))
    tile_b = int(min(tile_cap, tile_want))

    # Pad the batch to a tile multiple (padded rows are computed and dropped).
    B_pad = _round_up(B, tile_b)
    if B_pad != B:
        x = jnp.pad(x, ((0, B_pad - B), (0, 0)))

    grid = (B_pad // tile_b,)

    def const_spec(a):
        # Whole (tiny) array as one block, same block every grid step ->
        # DMA'd once, stays resident in VMEM.
        return pl.BlockSpec(a.shape, lambda i: (0, 0))

    out = pl.pallas_call(
        _mlp_kernel,
        out_shape=jax.ShapeDtypeStruct((1, B_pad), jnp.float32),
        grid=grid,
        in_specs=[
            pl.BlockSpec((tile_b, in_size), lambda i: (i, 0)),   # x, batch-tiled
            const_spec(w1), const_spec(b1),
            const_spec(w2), const_spec(b2),
            const_spec(w3), const_spec(b3),
            const_spec(w4_col), const_spec(b4),
        ],
        out_specs=pl.BlockSpec((1, tile_b), lambda i: (0, i)),
        compiler_params=pltpu.CompilerParams(
            dimension_semantics=("parallel",),
        ),
    )(x, w1, b1, w2, b2, w3, b3, w4_col, b4)

    # (1, B_pad) -> (B, 1): pure reshape + slice, no transpose.
    return out.reshape(B_pad, 1)[:B]


def _he_uniform_linear(key, fan_in, fan_out):
    """kaiming_uniform_(nonlinearity='relu'): bound = sqrt(2) * sqrt(3 / fan_in).

    Returns (W, b) with W in PyTorch layout [fan_out, fan_in] and bias as a
    [fan_out, 1] column filled with 0.1 (matches init.constant_(bias, 0.1))."""
    bound = np.sqrt(2.0) * np.sqrt(3.0 / fan_in)
    w = jax.random.uniform(key, (fan_out, fan_in), dtype=jnp.float32,
                           minval=-bound, maxval=bound)
    b = jnp.full((fan_out, 1), 0.1, dtype=jnp.float32)
    return w, b


def init_regression_model(key, input_size):
    k1, k2, k3, k4 = jax.random.split(key, 4)
    return (
        _he_uniform_linear(k1, input_size, 16),
        _he_uniform_linear(k2, 16, 8),
        _he_uniform_linear(k3, 8, 4),
        _he_uniform_linear(k4, 4, 1),
    )


def _reference_forward(x, params):
    (w1, b1), (w2, b2), (w3, b3), (w4, b4) = params
    h = jnp.maximum(x @ w1.T + b1.T, 0.0)
    h = jnp.maximum(h @ w2.T + b2.T, 0.0)
    h = jnp.maximum(h @ w3.T + b3.T, 0.0)
    return h @ w4.T + b4.T


if __name__ == "__main__":
    key = jax.random.PRNGKey(0)
    k_params, k_x = jax.random.split(key)

    batch, input_size = 256, 32          # small demo: 2 grid steps at tile_b=128
    params = init_regression_model(k_params, input_size)
    x = jax.random.normal(k_x, (batch, input_size), dtype=jnp.float32)

    y = regression_model_forward(x, params)
    y = jax.block_until_ready(y)

    y_ref = _reference_forward(x, params)
    assert y.shape == (batch, 1), y.shape
    np.testing.assert_allclose(np.asarray(y), np.asarray(y_ref),
                               rtol=1e-5, atol=1e-5)

    # Also exercise a batch that is not a multiple of the tile (padding path).
    x_small = x[:37]
    y_small = jax.block_until_ready(regression_model_forward(x_small, params))
    np.testing.assert_allclose(np.asarray(y_small), np.asarray(y_ref[:37]),
                               rtol=1e-5, atol=1e-5)

    print("KERNEL_OK")
</pallas_src>

<mosaic_0001>
module attributes {stable_mosaic.version = 11 : i64} {
  func.func @_mlp_kernel(%arg0: i32, %arg1: memref<128x32xf32, #tpu.memory_space<vmem>>, %arg2: memref<16x32xf32, #tpu.memory_space<vmem>>, %arg3: memref<16x1xf32, #tpu.memory_space<vmem>>, %arg4: memref<8x16xf32, #tpu.memory_space<vmem>>, %arg5: memref<8x1xf32, #tpu.memory_space<vmem>>, %arg6: memref<4x8xf32, #tpu.memory_space<vmem>>, %arg7: memref<4x1xf32, #tpu.memory_space<vmem>>, %arg8: memref<4x1xf32, #tpu.memory_space<vmem>>, %arg9: memref<1x1xf32, #tpu.memory_space<vmem>>, %arg10: memref<1x128xf32, #tpu.memory_space<vmem>>) attributes {dimension_semantics = [#tpu.dimension_semantics<parallel>], iteration_bounds = array<i64: 2>, scalar_prefetch = 0 : i64, scratch_operands = 0 : i64, tpu.core_type = #tpu.core_type<tc>, window_params = [{transform_indices = @transform_0, window_bounds = array<i64: 128, 32>}, {pipeline_mode = #tpu.pipeline_mode<synchronous>, transform_indices = @transform_1, window_bounds = array<i64: 16, 32>}, {pipeline_mode = #tpu.pipeline_mode<synchronous>, transform_indices = @transform_2, window_bounds = array<i64: 16, 1>}, {pipeline_mode = #tpu.pipeline_mode<synchronous>, transform_indices = @transform_3, window_bounds = array<i64: 8, 16>}, {pipeline_mode = #tpu.pipeline_mode<synchronous>, transform_indices = @transform_4, window_bounds = array<i64: 8, 1>}, {pipeline_mode = #tpu.pipeline_mode<synchronous>, transform_indices = @transform_5, window_bounds = array<i64: 4, 8>}, {pipeline_mode = #tpu.pipeline_mode<synchronous>, transform_indices = @transform_6, window_bounds = array<i64: 4, 1>}, {pipeline_mode = #tpu.pipeline_mode<synchronous>, transform_indices = @transform_7, window_bounds = array<i64: 4, 1>}, {pipeline_mode = #tpu.pipeline_mode<synchronous>, transform_indices = @transform_8, window_bounds = array<i64: 1, 1>}, {transform_indices = @transform_9, window_bounds = array<i64: 1, 128>}]} {
    %c0 = arith.constant 0 : index
    %c0_0 = arith.constant 0 : index
    %0 = vector.load %arg1[%c0, %c0_0] : memref<128x32xf32, #tpu.memory_space<vmem>>, vector<128x32xf32>
    %c0_1 = arith.constant 0 : index
    %c0_2 = arith.constant 0 : index
    %1 = vector.load %arg2[%c0_1, %c0_2] : memref<16x32xf32, #tpu.memory_space<vmem>>, vector<16x32xf32>
    %cst = arith.constant dense<0.000000e+00> : vector<16x128xf32>
    %2 = tpu.matmul %1, %0, %cst {dimension_numbers = #tpu.dot_dimension_numbers<[1], [1], [0], [0], [0, 0, 1, 0], [], []>} : vector<16x32xf32>, vector<128x32xf32>, vector<16x128xf32> -> vector<16x128xf32>
    %c0_3 = arith.constant 0 : index
    %c0_4 = arith.constant 0 : index
    %3 = vector.load %arg3[%c0_3, %c0_4] : memref<16x1xf32, #tpu.memory_space<vmem>>, vector<16x1xf32>
    %4 = vector.broadcast %3 : vector<16x1xf32> to vector<16x128xf32>
    %5 = arith.addf %2, %4 : vector<16x128xf32>
    %cst_5 = arith.constant 0.000000e+00 : f32
    %6 = vector.broadcast %cst_5 : f32 to vector<16x128xf32>
    %7 = arith.maximumf %5, %6 : vector<16x128xf32>
    %c0_6 = arith.constant 0 : index
    %c0_7 = arith.constant 0 : index
    %8 = vector.load %arg4[%c0_6, %c0_7] : memref<8x16xf32, #tpu.memory_space<vmem>>, vector<8x16xf32>
    %cst_8 = arith.constant dense<0.000000e+00> : vector<8x128xf32>
    %9 = tpu.matmul %8, %7, %cst_8 {dimension_numbers = #tpu.dot_dimension_numbers<[1], [0], [0], [1], [0, 0, 1, 1], [], []>} : vector<8x16xf32>, vector<16x128xf32>, vector<8x128xf32> -> vector<8x128xf32>
    %c0_9 = arith.constant 0 : index
    %c0_10 = arith.constant 0 : index
    %10 = vector.load %arg5[%c0_9, %c0_10] : memref<8x1xf32, #tpu.memory_space<vmem>>, vector<8x1xf32>
    %11 = vector.broadcast %10 : vector<8x1xf32> to vector<8x128xf32>
    %12 = arith.addf %9, %11 : vector<8x128xf32>
    %cst_11 = arith.constant 0.000000e+00 : f32
    %13 = vector.broadcast %cst_11 : f32 to vector<8x128xf32>
    %14 = arith.maximumf %12, %13 : vector<8x128xf32>
    %c0_12 = arith.constant 0 : index
    %c0_13 = arith.constant 0 : index
    %15 = vector.load %arg6[%c0_12, %c0_13] : memref<4x8xf32, #tpu.memory_space<vmem>>, vector<4x8xf32>
    %cst_14 = arith.constant dense<0.000000e+00> : vector<4x128xf32>
    %16 = tpu.matmul %15, %14, %cst_14 {dimension_numbers = #tpu.dot_dimension_numbers<[1], [0], [0], [1], [0, 0, 1, 1], [], []>} : vector<4x8xf32>, vector<8x128xf32>, vector<4x128xf32> -> vector<4x128xf32>
    %c0_15 = arith.constant 0 : index
    %c0_16 = arith.constant 0 : index
    %17 = vector.load %arg7[%c0_15, %c0_16] : memref<4x1xf32, #tpu.memory_space<vmem>>, vector<4x1xf32>
    %18 = vector.broadcast %17 : vector<4x1xf32> to vector<4x128xf32>
    %19 = arith.addf %16, %18 : vector<4x128xf32>
    %cst_17 = arith.constant 0.000000e+00 : f32
    %20 = vector.broadcast %cst_17 : f32 to vector<4x128xf32>
    %21 = arith.maximumf %19, %20 : vector<4x128xf32>
    %c0_18 = arith.constant 0 : index
    %c0_19 = arith.constant 0 : index
    %22 = vector.load %arg8[%c0_18, %c0_19] : memref<4x1xf32, #tpu.memory_space<vmem>>, vector<4x1xf32>
    %23 = vector.broadcast %22 : vector<4x1xf32> to vector<4x128xf32>
    %24 = arith.mulf %21, %23 : vector<4x128xf32>
    %cst_20 = arith.constant dense<0.000000e+00> : vector<128xf32>
    %25 = vector.multi_reduction <add>, %24, %cst_20 [0] : vector<4x128xf32> to vector<128xf32>
    %26 = vector.shape_cast %25 : vector<128xf32> to vector<1x128xf32>
    %c0_21 = arith.constant 0 : index
    %c0_22 = arith.constant 0 : index
    %27 = vector.load %arg9[%c0_21, %c0_22] : memref<1x1xf32, #tpu.memory_space<vmem>>, vector<1x1xf32>
    %28 = vector.broadcast %27 : vector<1x1xf32> to vector<1x128xf32>
    %29 = arith.addf %26, %28 : vector<1x128xf32>
    %c0_23 = arith.constant 0 : index
    %c0_24 = arith.constant 0 : index
    %30 = vector.load %arg10[%c0_23, %c0_24] : memref<1x128xf32, #tpu.memory_space<vmem>>, vector<1x128xf32>
    tpu.vector_store %arg10[%c0_23, %c0_24], %29 {strides = array<i32>} : memref<1x128xf32, #tpu.memory_space<vmem>>, vector<1x128xf32>,
    return
  }
  func.func @transform_0(%arg0: i32) -> (i32, i32) {
    %c0_i32 = arith.constant 0 : i32
    %c0_i32_0 = arith.constant 0 : i32
    return %arg0, %c0_i32 : i32, i32
  }
  func.func @transform_1(%arg0: i32) -> (i32, i32) {
    %c0_i32 = arith.constant 0 : i32
    %c0_i32_0 = arith.constant 0 : i32
    %c0_i32_1 = arith.constant 0 : i32
    return %c0_i32, %c0_i32_0 : i32, i32
  }
  func.func @transform_2(%arg0: i32) -> (i32, i32) {
    %c0_i32 = arith.constant 0 : i32
    %c0_i32_0 = arith.constant 0 : i32
    %c0_i32_1 = arith.constant 0 : i32
    return %c0_i32, %c0_i32_0 : i32, i32
  }
  func.func @transform_3(%arg0: i32) -> (i32, i32) {
    %c0_i32 = arith.constant 0 : i32
    %c0_i32_0 = arith.constant 0 : i32
    %c0_i32_1 = arith.constant 0 : i32
    return %c0_i32, %c0_i32_0 : i32, i32
  }
  func.func @transform_4(%arg0: i32) -> (i32, i32) {
    %c0_i32 = arith.constant 0 : i32
    %c0_i32_0 = arith.constant 0 : i32
    %c0_i32_1 = arith.constant 0 : i32
    return %c0_i32, %c0_i32_0 : i32, i32
  }
  func.func @transform_5(%arg0: i32) -> (i32, i32) {
    %c0_i32 = arith.constant 0 : i32
    %c0_i32_0 = arith.constant 0 : i32
    %c0_i32_1 = arith.constant 0 : i32
    return %c0_i32, %c0_i32_0 : i32, i32
  }
  func.func @transform_6(%arg0: i32) -> (i32, i32) {
    %c0_i32 = arith.constant 0 : i32
    %c0_i32_0 = arith.constant 0 : i32
    %c0_i32_1 = arith.constant 0 : i32
    return %c0_i32, %c0_i32_0 : i32, i32
  }
  func.func @transform_7(%arg0: i32) -> (i32, i32) {
    %c0_i32 = arith.constant 0 : i32
    %c0_i32_0 = arith.constant 0 : i32
    %c0_i32_1 = arith.constant 0 : i32
    return %c0_i32, %c0_i32_0 : i32, i32
  }
  func.func @transform_8(%arg0: i32) -> (i32, i32) {
    %c0_i32 = arith.constant 0 : i32
    %c0_i32_0 = arith.constant 0 : i32
    %c0_i32_1 = arith.constant 0 : i32
    return %c0_i32, %c0_i32_0 : i32, i32
  }
  func.func @transform_9(%arg0: i32) -> (i32, i32) {
    %c0_i32 = arith.constant 0 : i32
    %c0_i32_0 = arith.constant 0 : i32
    return %c0_i32, %arg0 : i32, i32
  }
}

</mosaic_0001>

<bundles_post_ra>
// kernel: tpu_custom_call.1
= control target key start
LH: loop header
LB: loop body
LE: loop exit
PB: predicated region body
PF: predicated region fallthrough
CT: control target
= control target key end

     0   :  { %s1258_s0 = inlined_call_operand.vmem [shape: f32[256,32], index: 0, kind: input, shape index: {}]   ;;  %s1259_s1 = inlined_call_operand.vmem [shape: f32[16,32], index: 1, kind: input, shape index: {}]   ;;  %s1260_s2 = inlined_call_operand.vmem [shape: f32[16,1], index: 2, kind: input, shape index: {}]   ;;  %s1261_s3 = inlined_call_operand.vmem [shape: f32[8,16], index: 3, kind: input, shape index: {}]   ;;  %s1262_s4 = inlined_call_operand.vmem [shape: f32[8,1], index: 4, kind: input, shape index: {}]   ;;  %s1263_s5 = inlined_call_operand.vmem [shape: f32[4,8], index: 5, kind: input, shape index: {}]   ;;  %s1264_s6 = inlined_call_operand.vmem [shape: f32[4,1], index: 6, kind: input, shape index: {}]   ;;  %s1265_s7 = inlined_call_operand.vmem [shape: f32[4,1], index: 7, kind: input, shape index: {}]   ;;  %s1266_s8 = inlined_call_operand.<no memory space> [shape: f32[1,1], index: 8, kind: input, shape index: {}]   ;;  %s1267_s9 = inlined_call_operand.hbm [shape: f32[1,256], index: 9, kind: output, shape index: {}]  }
   0x1   :  { %v14_v0 = vstv %s1266_s8 }
   0x2   :  { %15 = vst [vmem:[#allocation2] sm:$0x1] %v14_v0 }
   0x3   :  { %16 = vsyncpa [#allocation4], 0 }
   0x4   :  { %18 = vsyncpa [#allocation4 + $0x1], 0  ;;  %s1072_s11 = smov 0   ;;  %s1074_s12 = smov 0  }
   0x5   :  { %s1076_s13 = smov 0   ;;  %s1078_s14 = smov 0  }
   0x6 LB: > { %s754_s8 = sadd.s32 4294967295, %s1012_s14   ;;  %s755_s15 = sadd.s32 4294967294, %s1012_s14   ;;  %s1012_s14 = sphi %s1078_s14, %s1275_s14   ;;  %s1008_s13 = sphi %s1076_s13, %s1274_s13   ;;  %s1004_s12 = sphi %s1074_s12, %s1273_s12   ;;  %s1000_s11 = sphi %s1072_s11, %s1272_s11  }
   0x7   : > { %s1095_s16 = sadd.s32 1, %s1012_s14   ;;  %s225_s17 = sadd.s32 1, %s1008_s13 }
   0x8   : > { %s222_s18 = ssub.s32 %s1012_s14, %s1095_s16  ;;  %p235_p0 = scmp.ne.s32.totalorder %s1008_s13, %s1004_s12 }
   0x9   : > { %p223_p1 = scmp.eq.s32.totalorder %s222_s18, 0  ;;  %p236_p2 = scmp.eq.s32.totalorder %s754_s8, 1 }
   0xa   : > { %p241_p3 = scmp.ne.s32.totalorder %s1004_s12, %s1000_s11  ;;  %p242_p4 = scmp.eq.s32.totalorder %s755_s15, 1 }
   0xb   : > { %s1105_s19 = scalar_select %p223_p1, %s1008_s13, %s225_s17  }
   0xc   : > { %p1107_p5 = por %p236_p2, %p235_p0  ;;  %p1111_p6 = por %p242_p4, %p241_p3 }
   0xd   : > { %p758_p7 = scmp.ge.s32.totalorder %s1012_s14, 1  ;;  %p293_p8 = scmp.lt.s32.totalorder %s1012_s14, 3 }
   0xf   : > { %p294_p9 = pnand %p758_p7, %p293_p8 }
  0x10   : > { %s1117_s22 = sshll.u32 (!%p294_p9), %s754_s8, 4  ;;  %vm364_vm0 = vcmask (!%p294_p9), 261120   ;;  %v350_v1 = vld [vmem:[%s1259_s1] sm:$0xff] (!%p294_p9)  ;;  %v1014_v3 = vmov (!%p294_p9), 0   ;;  %v353_v4 = vld [vmem:[%s1260_s2 + $0x8] sm:$0xff] (!%p294_p9)  ;;  %v1015_v32 = vmov (!%p294_p9), 0.0|0.0   ;;  %v681_v60 = vlaneseq (!%p294_p9) }
  0x11   : > { %297 = sbr.rel (%p294_p9) target bundleno = 781 (0x30d), region = 56  ;;  %v352_v2 = vld [vmem:[%s1260_s2] sm:$0xff] (!%p294_p9)  ;;  %p329_p10 = scmp.lt.s32.totalorder (!%p294_p9), %s1117_s22, 31  ;;  %839 = vmatprep.mubr.msk.f32.mxu0 (!%p294_p9), %vm364_vm0, %v350_v1  ;;  %948 = vset.pattern.permute.xlu0 (!%p294_p9), %v1014_v3  ;;  %vm1138_vm1 = vmpackc.low (!%p294_p9), %vm364_vm0, %vm364_vm0  ;;  %v351_v31 = vld [vmem:[%s1259_s1 + $0x8] sm:$0xff] (!%p294_p9)  ;;  %vm1016_vm2 = vmmov (!%p294_p9), 0   ;;  %v1017_v33 = vmov (!%p294_p9), 0.0  }
  0x12   : > { %356 = vperm.xlu0 (!%p294_p9), %948, %v352_v2   ;;  %949 = vset.pattern.permute.xlu1 (!%p294_p9), %v1014_v3  ;;  %v660_v6 = vld [vmem:[%s1265_s7] sm:$0xf] (!%p294_p9)  ;;  %vm503_vm3 = vcmask (!%p294_p9), 130048   ;;  %vm585_vm4 = vcmask (!%p294_p9), 64512   ;;  %vm667_vm5 = vcmask (!%p294_p9), 1043456   ;;  %v682_v63 = vshrl.u32 (!%p294_p9), %v681_v60, 7  ;;  %s1216_s25 = scalar_lea.hbm (!%p294_p9), %s1267_s9, %s1117_s22 }
  0x13   : > { %902 = vmatprep.subr.bf16.mxu1 (!%p294_p9), %v1015_v32  ;;  %846 = vmatprep.mubr.msk.f32.mxu1 (!%p294_p9), %vm1016_vm2, %v1017_v33  ;;  %v497_v34 = vld [vmem:[%s1262_s4] sm:$0xff] (!%p294_p9)  ;;  %s1018_s28 = smov (!%p294_p9), [#allocation3]  }
  0x14   : > { %500 = vperm.xlu1 (!%p294_p9), %949, %v497_v34   ;;  %v579_v35 = vld [vmem:[%s1264_s6] sm:$0xf] (!%p294_p9)  ;;  %v683_v2 = vsub.s32 (!%p294_p9), 0, %v682_v63  ;;  %s954_s29 = sshll.u32 (!%p294_p9), %s1018_s28, 4  ;;  %s955_s29 = int_to_ptr.vmem [resolvable:$false] %s954_s29 }
  0x15   : > { %v675_v36 = vld [vmem:[#allocation2] sm:$0x1] (!%p294_p9) }
  0x16   : > { %361 = vperm.xlu0 (!%p294_p9), %948, %v353_v4   ;;  %v496_v46 = vld [vmem:[%s1261_s3] sm:$0xff] (!%p294_p9) }
  0x17   : > { %v578_v52 = vld [vmem:[%s1263_s5] sm:$0xf] (!%p294_p9) }
  0x18   : > { %s330_s27 = scalar_select %p329_p10, %s1117_s22, 31  ;;  %582 = vperm.xlu1 %949, %v579_v35  }
  0x1a   : > { %s760_s30 = sshll.u32 %s330_s27, 3  ;;  %663 = vperm.xlu0 %948, %v660_v6  }
  0x1b   : > { %s1134_s15 = scalar_lea.vmem %s1258_s0, %s760_s30  ;;  %s956_s30 = scalar_lea.vmem %s955_s29, 32 }
  0x1c   : > { %v334_v7 = vld [vmem:[%s1134_s15] sm:$0xff]  ;;  %v335_v8 = vld [vmem:[%s1134_s15 + $0x8] sm:$0xff]  ;;  %v336_v9 = vld [vmem:[%s1134_s15 + $0x10] sm:$0xff]  ;;  %678 = vperm.xlu1 %949, %v675_v36  }
  0x1d   : > { %v854_v10 = vpack.c.bf16 %v335_v8, %v334_v7  ;;  %v337_v11 = vld [vmem:[%s1134_s15 + $0x18] sm:$0xff]  ;;  %v338_v13 = vld [vmem:[%s1134_s15 + $0x20] sm:$0xff]  ;;  %v339_v14 = vld [vmem:[%s1134_s15 + $0x28] sm:$0xff] }
  0x1e   : > { %v860_v12 = vpack.c.bf16 %v337_v11, %v336_v9  ;;  %v866_v15 = vpack.c.bf16 %v339_v14, %v338_v13  ;;  %v340_v16 = vld [vmem:[%s1134_s15 + $0x30] sm:$0xff]  ;;  %v341_v17 = vld [vmem:[%s1134_s15 + $0x38] sm:$0xff]  ;;  %v342_v19 = vld [vmem:[%s1134_s15 + $0x40] sm:$0xff] }
  0x1f   : > { %856 = vmatprep.subr.msk.bf16.mxu0 %vm1138_vm1, %v854_v10  ;;  %v872_v18 = vpack.c.bf16 %v341_v17, %v340_v16  ;;  %v343_v20 = vld [vmem:[%s1134_s15 + $0x48] sm:$0xff]  ;;  %v344_v22 = vld [vmem:[%s1134_s15 + $0x50] sm:$0xff]  ;;  %v345_v23 = vld [vmem:[%s1134_s15 + $0x58] sm:$0xff] }
  0x20   : > { %859 = vmatpush3.bf16.xpose.msk.msra.mxu0 %vm1138_vm1, %v854_v10  ;;  %v878_v21 = vpack.c.bf16 %v343_v20, %v342_v19  ;;  %v884_v24 = vpack.c.bf16 %v345_v23, %v344_v22  ;;  %v346_v25 = vld [vmem:[%s1134_s15 + $0x60] sm:$0xff]  ;;  %v347_v26 = vld [vmem:[%s1134_s15 + $0x68] sm:$0xff]  ;;  %v348_v28 = vld [vmem:[%s1134_s15 + $0x70] sm:$0xff] }
  0x21   : > { %862 = vmatprep.subr.msk.bf16.mxu0 %vm1138_vm1, %v860_v12  ;;  %v890_v27 = vpack.c.bf16 %v347_v26, %v346_v25  ;;  %v349_v29 = vld [vmem:[%s1134_s15 + $0x78] sm:$0xff]  ;;  %s326_s15 = sand.u32 1, %s1004_s12  }
  0x22   : > { %v896_v30 = vpack.c.bf16 %v349_v29, %v348_v28  ;;  %s327_s17 = scalar_lea.vmem [#allocation3], %s326_s15  ;;  %s688_s26 = scalar_lea.sflag [#allocation4], %s326_s15 }
  0x23   : > { %s700_s18 = sshll.u32 %s327_s17, 4  ;;  %s1218_s18 = int_to_ptr.vmem [resolvable:$true] %s700_s18 }
  0x24   : > { %s950_s27 = scalar_lea.vmem %s1218_s18, 16  ;;  %p957_p0 = scmp.lt.s32.totalorder %s1218_s18, %s955_s29 }
  0x25   : > { %p951_p11 = scmp.ne.s32.totalorder %s1218_s18, %s950_s27  ;;  %p958_p1 = scmp.lt.s32.totalorder %s956_s30, %s950_s27 }
  0x27   : > { %p952_p12 = pnand %p951_p11, %p1107_p5  ;;  %p959_p2 = por %p958_p1, %p957_p0 }
  0x28   : > { %865 = vmatpush3.bf16.xpose.msk.msra.mxu0 %vm1138_vm1, %v860_v12 }
  0x29   : > { %868 = vmatprep.subr.msk.bf16.mxu0 %vm1138_vm1, %v866_v15  ;;  %p953_p13 = pneg %p952_p12 }
  0x2b   : > { %p960_p3 = pnand %p959_p2, %p953_p13 }
  0x30   : > { %871 = vmatpush3.bf16.xpose.msk.msra.mxu0 %vm1138_vm1, %v866_v15 }
  0x31   : > { %874 = vmatprep.subr.msk.bf16.mxu0 %vm1138_vm1, %v872_v18 }
  0x38   : > { %877 = vmatpush3.bf16.xpose.msk.msra.mxu0 %vm1138_vm1, %v872_v18 }
  0x39   : > { %880 = vmatprep.subr.msk.bf16.mxu0 %vm1138_vm1, %v878_v21 }
  0x40   : > { %883 = vmatpush3.bf16.xpose.msk.msra.mxu0 %vm1138_vm1, %v878_v21 }
  0x41   : > { %886 = vmatprep.subr.msk.bf16.mxu0 %vm1138_vm1, %v884_v24 }
  0x48   : > { %889 = vmatpush3.bf16.xpose.msk.msra.mxu0 %vm1138_vm1, %v884_v24 }
  0x49   : > { %892 = vmatprep.subr.msk.bf16.mxu0 %vm1138_vm1, %v890_v27 }
  0x50   : > { %895 = vmatpush3.bf16.xpose.msk.msra.mxu0 %vm1138_vm1, %v890_v27 }
  0x51   : > { %898 = vmatprep.subr.msk.bf16.mxu0 %vm1138_vm1, %v896_v30 }
  0x58   : > { %901 = vmatpush3.bf16.xpose.msk.msra.mxu0 %vm1138_vm1, %v896_v30 }
  0x5f   : > { %840 = vmatmul.mubr.msk.f32.vlgmr.msra.gmra.mrb[0].mxu0 %vm364_vm0, %v351_v31 }
  0x91   : > { %v357_v37 = vpop.permute.xlu0 %356 }
  0x93   : > { %v501_v47 = vpop.permute.xlu1 %500 }
  0x95   : > { %v362_v38 = vpop.permute.xlu0 %361 }
  0x97   : > { %v583_v53 = vpop.permute.xlu1 %582 }
  0x99   : > { %v664_v58 = vpop.permute.xlu0 %663 }
  0x9b   : > { %v679_v4 = vpop.permute.xlu1 %678 }
  0x9c   : > { %v684_v6 = vrot.slane %v679_v4, %v683_v2 }
 0x132   : > { %v841_v39 = vpop.f32.mrb[0].mxu0 }
 0x133   : > { %v491_v40 = vadd.f32 %v841_v39, %v362_v38  ;;  %v485_v41 = vpop.f32.mrb[1].mxu0 }
 0x134   : > { %v486_v42 = vadd.f32 %v485_v41, %v357_v37 }
 0x135   : > { %v495_v43 = vmax.f32 %v491_v40, 0.0 }
 0x136   : > { %v494_v44 = vmax.f32 %v486_v42, 0.0 }
 0x138   : > { %v903_v45 = vpack.c.bf16 %v495_v43, %v494_v44 }
 0x13a   : > { %904 = vmatpush3.bf16.msra.mxu1 %v903_v45 }
 0x13b   : > { %849 = vmatprep.subr.mxu1 %v1017_v33 }
 0x13d   : > { %847 = vmatmul.mubr.msk.f32.vlgmr.msra.gmra.mrb[0].mxu1 %vm503_vm3, %v496_v46 }
 0x13e   : > { %851 = vmatprep.mubr.msk.f32.mxu1 %vm1016_vm2, %v1017_v33 }
 0x210   : > { %v573_v48 = vpop.f32.mrb[0].mxu1 }
 0x211   : > { %v574_v49 = vadd.f32 %v573_v48, %v501_v47  ;;  %v848_v50 = vpop.f32.mrb[1].mxu1 }
 0x213   : > { %v577_v51 = vmax.f32 %v574_v49, 0.0 }
 0x215   : > { %850 = vmatpush3.msra.mxu1 %v577_v51 }
 0x216   : > { %852 = vmatmul.mubr.msk.f32.vlgmr.msra.gmra.mrb[2].mxu1 %vm585_vm4, %v578_v52 }
 0x2e9   : > { %v655_v54 = vpop.f32.mrb[2].mxu1 }
 0x2ea   : > { %v656_v55 = vadd.f32 %v655_v54, %v583_v53  ;;  %v853_v56 = vpop.f32.mrb[3].mxu1 }
 0x2ec   : > { %v659_v57 = vmax.f32 %v656_v55, 0.0 }
 0x2ee   : > { %v666_v59 = vmul.f32 %v664_v58, %v659_v57 }
 0x2f0   : > { %v668_v61 = vsel %vm667_vm5, %v666_v59, 0.0 }
 0x2f1   : > { %v669_v62 = vrot.slane %v668_v61, 4 }
 0x2f3   : > { %v670_v0 = vadd.f32 %v669_v62, %v668_v61 }
 0x2f5   : > { %v671_v1 = vrot.slane %v670_v0, 2 }
 0x2f7   : > { %v672_v3 = vadd.f32 %v671_v1, %v670_v0 }
 0x2f9   : > { %v673_v5 = vrot.slane %v672_v3, 1 }
 0x2fb   : > { %v674_v7 = vadd.f32 %v673_v5, %v672_v3 }
 0x2fd   : > { %v685_v8 = vadd.f32 %v684_v6, %v674_v7 }
 0x2ff   : > { %686 = vst [vmem:[%s327_s17] sm:$0x1] %v685_v8 }
 0x300   : > { %963 = shalt.err (!%p960_p3)
}
 0x301   : > { %s964_s22 = scalar_lea.hbm %s1216_s25, 16  ;;  %s968_s15 = scalar_lea.hbm %s1267_s9, 32 }
 0x302   : > { %p965_p4 = scmp.ne.s32.totalorder %s1216_s25, %s964_s22  ;;  %p969_p9 = scmp.lt.u32.totalorder %s1216_s25, %s1267_s9 }
 0x303   : > { %p970_p10 = scmp.lt.u32.totalorder %s968_s15, %s964_s22  ;;  %p972_p12 = scmp.lt.u32.totalorder %s964_s22, %s1216_s25 }
 0x304   : > { %p966_p7 = pnand %p965_p4, %p1107_p5 }
 0x305   : > { %p971_p11 = por %p970_p10, %p969_p9 }
 0x306   : > { %p967_p8 = pneg %p966_p7 }
 0x307   : > { %p973_p13 = por %p972_p12, %p971_p11 }
 0x309   : > { %p974_p0 = pnand %p973_p13, %p967_p8 }
 0x30b   : > { %977 = shalt.err (!%p974_p0)
}
 0x30c   : > { %905 = dma.vmem_to_hbm [thread:$0]  (%p1107_p5), %s1218_s18, 16, %s1216_s25, %s688_s26  }
 0x30d PF: > { %p911_p1 = scmp.ge.s32.totalorder %s1012_s14, 2  ;;  %s712_s24 = sand.u32 1, %s1000_s11  }
 0x30e   : > { %s713_s27 = scalar_lea.sflag [#allocation4], %s712_s24 }
 0x30f   : > { %p908_p2 = pnand %p911_p1, %p1111_p6 }
 0x311   : > { %995 = dma.done.wait (!%p908_p2), %s713_s27, 16  }
 0x312   : > { %997 = vsyncadd (!%p908_p2), %s713_s27, 4294967280  ;;  %p21_p3 = scmp.ge.s32.totalorder %s1095_s16, 4   ;;  %s1272_s11 = smov %s1004_s12 }
 0x313   : > { %s1273_s12 = smov %s1008_s13  ;;  %s1274_s13 = smov %s1105_s19 }
 0x314   : > { %s1275_s14 = smov %s1095_s16  ;;  %23 = sbr.rel (!%p21_p3) target bundleno = 6 (0x6), region = 91 }
 0x31b   :  { %717 = vsyncpa [#allocation4], 1 }
 0x31c   :  { %719 = vsyncpa [#allocation4 + $0x1], 1 }

</bundles_post_ra>
